<compile_context>
chip_gen: v7x
topology: tpu7x:2x2x1
jax: 0.10.0
libtpu: 0.0.40
codegen_flags: <defaults>
</compile_context>

<pallas_src>
import functools

import jax
import jax.numpy as jnp
from jax.experimental import pallas as pl
from jax.experimental.pallas import tpu as pltpu


def _ce_kernel(preds_ref, target_ref, out_ref, *, label_smoothing: float):
    x = preds_ref[...].astype(jnp.float32)             # (TM, C) upcast in-kernel
    tgt = target_ref[...]                               # (TM, 1) int32
    tm, n_classes = x.shape

    # Numerically stable logsumexp over the class (lane) axis.
    m = jnp.max(x, axis=-1, keepdims=True)              # (TM, 1)
    se = jnp.sum(jnp.exp(x - m), axis=-1, keepdims=True)
    lse = jnp.log(se) + m                                # (TM, 1)

    # -sum_c log_p = C*lse - sum_c(x)   (no (TM, C) log_preds temporary)
    sum_x = jnp.sum(x, axis=-1, keepdims=True)           # (TM, 1)
    neg_sum_logp = jnp.float32(n_classes) * lse - sum_x

    # -log_p[i, target[i]] = lse - x[i, target[i]]
    # Gather via a cheap (1, C) lane-iota broadcast against the (TM, 1) target.
    col_ids = jax.lax.broadcasted_iota(jnp.int32, (1, n_classes), 1)
    picked_x = jnp.sum(jnp.where(col_ids == tgt, x, 0.0),
                       axis=-1, keepdims=True)            # (TM, 1)
    nll_rows = lse - picked_x                             # (TM, 1)

    # Fused, pre-scaled per-row loss (keeps magnitudes O(loss), not O(C*lse)).
    ls = jnp.float32(label_smoothing)
    out_ref[...] = ((ls / jnp.float32(n_classes)) * neg_sum_logp
                    + (1.0 - ls) * nll_rows)


def cross_entropy_loss(preds, target, label_smoothing: float = 0.1,
                       block_rows=None):
    """preds: (N, C) float logits (any float dtype), target: (N,) ints.
    Returns scalar float32 label-smoothed cross-entropy (reduction='mean')."""
    preds = jnp.asarray(preds)                      # native dtype, no upcast here
    n, c = preds.shape
    target2d = jnp.asarray(target).astype(jnp.int32).reshape(n, 1)
    itemsize = preds.dtype.itemsize

    # VMEM-capacity-aware tile target: ~4 MiB on 128 MiB-VMEM chips (v5e/v6e),
    # ~2 MiB on 64 MiB-VMEM chips (v7x) to leave headroom for f32 temporaries.
    try:
        vmem_cap = int(pltpu.get_tpu_info().vmem_capacity_bytes)
    except Exception:
        vmem_cap = 128 * 1024 * 1024
    tile_target = (4 * 1024 * 1024 if vmem_cap >= 96 * 1024 * 1024
                   else 2 * 1024 * 1024)

    # Sublane alignment by dtype packing (8 for f32, 16 for bf16, 32 for int8).
    align = {4: 8, 2: 16, 1: 32}.get(itemsize, 8)

    if block_rows is None:
        bytes_per_row = max(1, c * itemsize)
        block_rows = max(align, min(8192, tile_target // bytes_per_row))
    if block_rows >= n:
        block_rows = n                              # single block == full extent
    else:
        block_rows = max(align, (block_rows // align) * align)

    num_tiles = pl.cdiv(n, block_rows)

    # VMEM budget: double-buffered input/output blocks plus ~4 full-tile f32
    # intermediates (upcast / exp / select / mask), capped below physical VMEM.
    in_block_bytes = block_rows * (c * itemsize + 4 + 4)   # logits + tgt + out
    f32_tmp_bytes = 4 * block_rows * c * 4
    need = 2 * 2 * in_block_bytes + f32_tmp_bytes + (2 << 20)
    vmem_limit = int(max(32 * 1024 * 1024, min(vmem_cap - (8 << 20), need)))

    kernel = functools.partial(_ce_kernel,
                               label_smoothing=float(label_smoothing))

    per_row = pl.pallas_call(
        kernel,
        out_shape=jax.ShapeDtypeStruct((n, 1), jnp.float32),
        grid_spec=pltpu.PrefetchScalarGridSpec(
            num_scalar_prefetch=0,
            grid=(num_tiles,),
            in_specs=[
                pl.BlockSpec((block_rows, c), lambda i: (i, 0)),
                pl.BlockSpec((block_rows, 1), lambda i: (i, 0)),
            ],
            out_specs=pl.BlockSpec((block_rows, 1), lambda i: (i, 0)),
        ),
        compiler_params=pltpu.CompilerParams(
            dimension_semantics=("parallel",),       # tiles are independent
            vmem_limit_bytes=vmem_limit,
        ),
    )(preds, target2d)

    # Tiny finishing reduction in JAX (tree-reduced f32 => good numerics).
    return jnp.sum(per_row) / jnp.float32(n)


def _reference(preds, target, label_smoothing=0.1):
    # Pure-JAX reference mirroring the PyTorch module.
    n = preds.shape[-1]
    log_preds = jax.nn.log_softmax(preds.astype(jnp.float32), axis=-1)
    loss = jnp.mean(-jnp.sum(log_preds, axis=-1))
    nll = jnp.mean(-jnp.take_along_axis(log_preds, target[:, None], axis=-1))
    return label_smoothing * (loss / n) + (1 - label_smoothing) * nll


if __name__ == "__main__":
    key = jax.random.PRNGKey(0)
    k1, k2, k3, k4 = jax.random.split(key, 4)

    # Case 1: small, explicit block_rows=8 -> exercises multi-tile grid with a
    # remainder tile (N=20 not divisible by 8).
    N, C = 20, 32
    preds = jax.random.normal(k1, (N, C), dtype=jnp.float32)
    target = jax.random.randint(k2, (N,), 0, C, dtype=jnp.int32)
    out = cross_entropy_loss(preds, target, label_smoothing=0.1, block_rows=8)
    jax.block_until_ready(out)
    ref = _reference(preds, target, label_smoothing=0.1)
    assert jnp.allclose(out, ref, rtol=1e-5, atol=1e-5), (out, ref)

    # Case 2: auto tile sizing path (single full-extent block).
    N2, C2 = 64, 128
    preds2 = jax.random.normal(k3, (N2, C2), dtype=jnp.float32)
    target2 = jax.random.randint(k4, (N2,), 0, C2, dtype=jnp.int32)
    out2 = cross_entropy_loss(preds2, target2, label_smoothing=0.1)
    jax.block_until_ready(out2)
    ref2 = _reference(preds2, target2, label_smoothing=0.1)
    assert jnp.allclose(out2, ref2, rtol=1e-5, atol=1e-5), (out2, ref2)

    print("KERNEL_OK")
</pallas_src>

<mosaic_0001>
module attributes {stable_mosaic.version = 11 : i64} {
  func.func @_ce_kernel(%arg0: i32, %arg1: memref<8x32xf32, #tpu.memory_space<vmem>>, %arg2: memref<8x1xi32, #tpu.memory_space<vmem>>, %arg3: memref<8x1xf32, #tpu.memory_space<vmem>>) attributes {dimension_semantics = [#tpu.dimension_semantics<parallel>], iteration_bounds = array<i64: 3>, scalar_prefetch = 0 : i64, scratch_operands = 0 : i64, tpu.core_type = #tpu.core_type<tc>, window_params = [{transform_indices = @transform_0, window_bounds = array<i64: 8, 32>}, {transform_indices = @transform_1, window_bounds = array<i64: 8, 1>}, {transform_indices = @transform_2, window_bounds = array<i64: 8, 1>}]} {
    %c0 = arith.constant 0 : index
    %c0_0 = arith.constant 0 : index
    %0 = vector.load %arg1[%c0, %c0_0] : memref<8x32xf32, #tpu.memory_space<vmem>>, vector<8x32xf32>
    %c0_1 = arith.constant 0 : index
    %c0_2 = arith.constant 0 : index
    %1 = vector.load %arg2[%c0_1, %c0_2] : memref<8x1xi32, #tpu.memory_space<vmem>>, vector<8x1xi32>
    %cst = arith.constant dense<0xFF800000> : vector<8xf32>
    %2 = vector.multi_reduction <maximumf>, %0, %cst [1] : vector<8x32xf32> to vector<8xf32>
    %3 = vector.shape_cast %2 : vector<8xf32> to vector<8x1xf32>
    %4 = vector.broadcast %3 : vector<8x1xf32> to vector<8x32xf32>
    %5 = arith.subf %0, %4 : vector<8x32xf32>
    %6 = math.exp %5 : vector<8x32xf32>
    %cst_3 = arith.constant dense<0.000000e+00> : vector<8xf32>
    %7 = vector.multi_reduction <add>, %6, %cst_3 [1] : vector<8x32xf32> to vector<8xf32>
    %8 = vector.shape_cast %7 : vector<8xf32> to vector<8x1xf32>
    %9 = math.log %8 : vector<8x1xf32>
    %10 = arith.addf %9, %3 : vector<8x1xf32>
    %cst_4 = arith.constant dense<0.000000e+00> : vector<8xf32>
    %11 = vector.multi_reduction <add>, %0, %cst_4 [1] : vector<8x32xf32> to vector<8xf32>
    %12 = vector.shape_cast %11 : vector<8xf32> to vector<8x1xf32>
    %cst_5 = arith.constant 3.200000e+01 : f32
    %13 = vector.broadcast %cst_5 : f32 to vector<8x1xf32>
    %14 = arith.mulf %13, %10 : vector<8x1xf32>
    %15 = arith.subf %14, %12 : vector<8x1xf32>
    %16 = tpu.iota {dimensions = array<i32: 1>} : vector<1x32xi32>
    %17 = vector.broadcast %16 : vector<1x32xi32> to vector<8x32xi32>
    %18 = vector.broadcast %1 : vector<8x1xi32> to vector<8x32xi32>
    %19 = arith.cmpi eq, %17, %18 : vector<8x32xi32>
    %cst_6 = arith.constant 0.000000e+00 : f32
    %20 = vector.broadcast %cst_6 : f32 to vector<8x32xf32>
    %21 = arith.select %19, %0, %20 : vector<8x32xi1>, vector<8x32xf32>
    %cst_7 = arith.constant dense<0.000000e+00> : vector<8xf32>
    %22 = vector.multi_reduction <add>, %21, %cst_7 [1] : vector<8x32xf32> to vector<8xf32>
    %23 = vector.shape_cast %22 : vector<8xf32> to vector<8x1xf32>
    %24 = arith.subf %10, %23 : vector<8x1xf32>
    %cst_8 = arith.constant 1.000000e-01 : f32
    %cst_9 = arith.constant 3.200000e+01 : f32
    %25 = arith.divf %cst_8, %cst_9 : f32
    %26 = vector.broadcast %25 : f32 to vector<8x1xf32>
    %27 = arith.mulf %26, %15 : vector<8x1xf32>
    %cst_10 = arith.constant 1.000000e+00 : f32
    %cst_11 = arith.constant 1.000000e-01 : f32
    %28 = arith.subf %cst_10, %cst_11 : f32
    %29 = vector.broadcast %28 : f32 to vector<8x1xf32>
    %30 = arith.mulf %29, %24 : vector<8x1xf32>
    %31 = arith.addf %27, %30 : vector<8x1xf32>
    %c0_12 = arith.constant 0 : index
    %c0_13 = arith.constant 0 : index
    %32 = vector.load %arg3[%c0_12, %c0_13] : memref<8x1xf32, #tpu.memory_space<vmem>>, vector<8x1xf32>
    tpu.vector_store %arg3[%c0_12, %c0_13], %31 {strides = array<i32>} : memref<8x1xf32, #tpu.memory_space<vmem>>, vector<8x1xf32>,
    return
  }
  func.func @transform_0(%arg0: i32) -> (i32, i32) {
    %c0_i32 = arith.constant 0 : i32
    %c0_i32_0 = arith.constant 0 : i32
    return %arg0, %c0_i32 : i32, i32
  }
  func.func @transform_1(%arg0: i32) -> (i32, i32) {
    %c0_i32 = arith.constant 0 : i32
    %c0_i32_0 = arith.constant 0 : i32
    return %arg0, %c0_i32 : i32, i32
  }
  func.func @transform_2(%arg0: i32) -> (i32, i32) {
    %c0_i32 = arith.constant 0 : i32
    %c0_i32_0 = arith.constant 0 : i32
    return %arg0, %c0_i32 : i32, i32
  }
}

</mosaic_0001>

<bundles_post_ra>
// kernel: tpu_custom_call.1
= control target key start
LH: loop header
LB: loop body
LE: loop exit
PB: predicated region body
PF: predicated region fallthrough
CT: control target
= control target key end

     0   :  { %s305_s9 = smov 0   ;;  %s334_s0 = inlined_call_operand.vmem [shape: f32[20,32], index: 0, kind: input, shape index: {}]   ;;  %s335_s1 = inlined_call_operand.vmem [shape: s32[20,1], index: 1, kind: input, shape index: {}]   ;;  %s336_s2 = inlined_call_operand.vmem [shape: f32[20,1], index: 2, kind: output, shape index: {}]  }
   0x1 LB: > { %s257_s10 = sadd.s32 4294967295, %s287_s9   ;;  %p261_p0 = scmp.ge.s32.totalorder %s287_s9, 1  ;;  %s287_s9 = sphi %s305_s9, %s12_s9  }
   0x2   : > { %p120_p1 = scmp.lt.s32.totalorder %s287_s9, 4 }
   0x4   : > { %p121_p2 = pnand %p261_p0, %p120_p1 }
   0x5   : > { %p144_p3 = scmp.lt.s32.totalorder (!%p121_p2), %s257_s10, 2  ;;  %v289_v0 = vmov (!%p121_p2), 0   ;;  %vm158_vm0 = vcmask (!%p121_p2), 261120   ;;  %v176_v7 = vlaneseq (!%p121_p2)  ;;  %vm190_vm2 = vcmask (!%p121_p2), 7168  }
   0x6   : > { %124 = sbr.rel (%p121_p2) target bundleno = 342 (0x156), region = 28  ;;  %276 = vset.pattern.permute.xlu0 (!%p121_p2), %v289_v0 }
   0x7   : > { %v177_v8 = vand.u32 (!%p121_p2), 127, %v176_v7 }
   0xd   : > { %s338_s10 = smov (!%p144_p3, %s257_s10), 2 }
   0xe   : > { %s313_s11 = sshll.u32 %s338_s10, 3 }
   0xf   : > { %s147_s14 = scalar_lea.vmem %s334_s0, %s313_s11  ;;  %s151_s17 = scalar_lea.vmem %s335_s1, %s313_s11 }
  0x10   : > { %v156_v1 = vld [vmem:[%s147_s14] sm:$0xff]  ;;  %s155_s20 = scalar_lea.vmem %s336_s2, %s313_s11 }
  0x11   : > { %v159_v2 = vsel %vm158_vm0, %v156_v1, -inf  ;;  %v157_v3 = vld [vmem:[%s151_s17] sm:$0xff]  ;;  %v171_v12 = vsel %vm158_vm0, %v156_v1, 0.0 }
  0x12   : > { %160 = vmax.xlane.f32.xlu0 %v159_v2 }
  0x28   : > { %179 = vperm.xlu0 %276, %v157_v3  }
  0x9f   : > { %v161_v4 = vpop.xlane.xlu0 %160 }
  0xa0   : > { %v162_v5 = vsub.f32 %v156_v1, %v161_v4 }
  0xa2   : > { %v163_v6 = vmul.f32 1.442695, %v162_v5 }
  0xa4   : > { %277 = vpow2.f32 %v163_v6 }
  0xa7   : > { %v180_v9 = vpop.permute.xlu0 %179 }
  0xa8   : > { %vm181_vm1 = vcmp.eq.s32.totalorder %v177_v8, %v180_v9 }
  0xa9   : > { %v182_v13 = vsel %vm181_vm1, %v156_v1, 0.0 }
  0xaa   : > { %v183_v14 = vsel %vm158_vm0, %v182_v13, 0.0 }
  0xae   : > { %v278_v10 = vpop.eup %277 }
  0xaf   : > { %v165_v11 = vsel %vm158_vm0, %v278_v10, 0.0 }
  0xb0   : > { %166 = vadd.xlane.f32.xlu1 %v165_v11 }
  0xb4   : > { %172 = vadd.xlane.f32.xlu1 %v171_v12 }
  0xb8   : > { %184 = vadd.xlane.f32.xlu1 %v183_v14 }
 0x13d   : > { %v167_v15 = vpop.xlane.xlu1 %166 }
 0x13e   : > { %279 = vlog2.f32 %v167_v15 }
 0x141   : > { %v173_v16 = vpop.xlane.xlu1 %172 }
 0x145   : > { %v185_v19 = vpop.xlane.xlu1 %184 }
 0x148   : > { %v280_v17 = vpop.eup %279 }
 0x149   : > { %v169_v18 = vmul.f32 0.6931472, %v280_v17 }
 0x14b   : > { %v170_v20 = vadd.f32 %v169_v18, %v161_v4 }
 0x14d   : > { %v174_v21 = vmul.f32 32.0, %v170_v20  ;;  %v186_v22 = vsub.f32 %v170_v20, %v185_v19 }
 0x14f   : > { %v175_v23 = vsub.f32 %v174_v21, %v173_v16  ;;  %v188_v25 = vmul.f32 0.9, %v186_v22 }
 0x151   : > { %v187_v24 = vmul.f32 0.003125, %v175_v23 }
 0x153   : > { %v189_v26 = vadd.f32 %v188_v25, %v187_v24 }
 0x155   : > { %191 = vst.msk [vmem:[%s155_s20] sm:$0xff] %vm190_vm2, %v189_v26 }
 0x156 PF: > { %s12_s9 = sadd.s32 1, %s287_s9  }
 0x157   : > { %p9_p4 = scmp.ge.s32.totalorder %s12_s9, 5  }
 0x159   :  { %11 = sbr.rel (!%p9_p4) target bundleno = 1 (0x1), region = 61 }

</bundles_post_ra>
